<compile_context>
chip_gen: v7x
topology: tpu7x:2x2x1
jax: 0.10.0
libtpu: 0.0.40
codegen_flags: <defaults>
</compile_context>

<pallas_src>
import jax
import jax.numpy as jnp
from jax.experimental import pallas as pl
from jax.experimental.pallas import tpu as pltpu

_LANE = 128
_SUBLANE = 8


def _round_up(x, m):
    return ((x + m - 1) // m) * m


def _vmem_capacity_bytes():
    """Per-core VMEM capacity (v5e/v6e: 128 MiB, v7x: 64 MiB) with a safe fallback."""
    cap = None
    try:
        cap = getattr(pltpu.get_tpu_info(), "vmem_capacity_bytes", None)
    except Exception:
        cap = None
    if not cap:
        cap = 64 * 1024 * 1024  # conservative (v7x per-TC VMEM)
    return int(min(max(int(cap), 32 * 1024 * 1024), 128 * 1024 * 1024))


# ----------------------------------------------------------------- small F --
def _logreg_featmajor_kernel(xt_ref, w_ref, b_ref, o_ref):
    # xt_ref: (F, TB) x tile, batch on the 128-lane axis (native input dtype)
    # w_ref : (F, 1)  weights, resident in VMEM, broadcast over lanes
    # b_ref : (1,)    bias scalar in SMEM
    # o_ref : (1, TB) lane-dense output row
    x = xt_ref[...].astype(jnp.float32)          # cast in-kernel (VPU), not in wrapper
    w = w_ref[...].astype(jnp.float32)
    z = jnp.sum(x * w, axis=0, keepdims=True) + b_ref[0]        # (1, TB)
    # Inf-safe sigmoid; exact reciprocal (bandwidth-bound kernel, divide is free).
    o_ref[...] = (1.0 / (1.0 + jnp.exp(-z))).astype(o_ref.dtype)


# ----------------------------------------------------------------- large F --
def _logreg_rowmajor_kernel(x_ref, w_ref, b_ref, o_ref, acc_ref):
    # x_ref: (TM, TF) native row-major tile; w_ref: (1, TF);
    # o_ref/acc_ref: (TM, 1); b_ref: (1,) SMEM scalar.
    k = pl.program_id(1)

    @pl.when(k == 0)
    def _():
        acc_ref[...] = jnp.zeros_like(acc_ref)

    x = x_ref[...].astype(jnp.float32)
    w = w_ref[...].astype(jnp.float32)
    acc_ref[...] += jnp.sum(x * w, axis=1, keepdims=True)        # lane reduce over F

    @pl.when(k == pl.num_programs(1) - 1)
    def _():
        z = acc_ref[...] + b_ref[0]
        o_ref[...] = (1.0 / (1.0 + jnp.exp(-z))).astype(o_ref.dtype)


def logistic_regression3_forward(x, w, b, *, x_feature_major=False,
                                 feature_major_threshold=64,
                                 max_block_b=None, max_block_m=None):
    """Forward pass of LogisticRegression3: sigmoid(x @ w.T + b) -> (B, 1).

    x: (B, F) input (or (F, B) if x_feature_major=True and F is small),
    w: (1, F) PyTorch Linear weight, b: (1,) bias.
    """
    if x_feature_major:
        F, B = x.shape
    else:
        B, F = x.shape
    out_dtype = x.dtype
    itemsize = jnp.dtype(x.dtype).itemsize
    out_itemsize = jnp.dtype(out_dtype).itemsize
    # Sublane packing granularity for the input dtype (8 f32 / 16 bf16 / 32 int8).
    sub = _SUBLANE * max(1, 4 // itemsize)

    # Generation-aware VMEM budget: blocks ~cap/4, scoped limit cap/2, the rest
    # is headroom for Mosaic temporaries of the elementwise/reduce chain.
    vmem_cap = _vmem_capacity_bytes()
    vmem_limit = vmem_cap // 2
    block_budget = vmem_cap // 4

    w_flat = jnp.reshape(w, (F,))
    b1 = jnp.reshape(b.astype(jnp.float32), (1,))

    cost = pl.CostEstimate(
        flops=2 * B * F + 3 * B,
        transcendentals=B,
        bytes_accessed=(B * F + F) * itemsize + (B + 1) * out_itemsize,
    )

    if F < feature_major_threshold:
        # ---- tiny F: batch on lanes, lane-dense (1, TB) output ----
        xt = x if x_feature_major else jnp.transpose(x)          # (F, B)
        w_col = jnp.reshape(w_flat, (F, 1))

        # Per-lane VMEM bytes: double-buffered x column (sublane padded) +
        # double-buffered output column (8-sublane padded).
        per_lane_bytes = 2 * (_round_up(F, sub) * itemsize + _SUBLANE * out_itemsize)
        tb_budget = max(_LANE, (block_budget // per_lane_bytes) // _LANE * _LANE)
        if max_block_b is not None:
            tb_budget = min(tb_budget, max(_LANE, _round_up(max_block_b, _LANE)))
        # Full-extent block when the whole batch fits; otherwise a 128-aligned
        # tile (last tile overshoots -> masked store, no wrapper padding).
        tb = B if B <= tb_budget else tb_budget
        grid = (pl.cdiv(B, tb),)

        out = pl.pallas_call(
            _logreg_featmajor_kernel,
            out_shape=jax.ShapeDtypeStruct((1, B), out_dtype),
            grid=grid,
            in_specs=[
                pl.BlockSpec((F, tb), lambda i: (0, i)),               # x tile, pipelined
                pl.BlockSpec((F, 1), lambda i: (0, 0)),                # weights, resident
                pl.BlockSpec(memory_space=pltpu.MemorySpace.SMEM),     # bias scalar
            ],
            out_specs=pl.BlockSpec((1, tb), lambda i: (0, i)),
            compiler_params=pltpu.CompilerParams(
                dimension_semantics=("parallel",),
                vmem_limit_bytes=vmem_limit,
            ),
            cost_estimate=cost,
        )(xt, w_col, b1)
        return jnp.reshape(out[0], (B, 1))

    # ---- large F: transpose-free blocking of the native (B, F) array ----
    assert not x_feature_major, "feature-major input is only used for small F"

    # F tile must divide F exactly (a partially-garbage tail would be reduced).
    tf = F
    if F % _LANE == 0:
        for cand in (2048, 1024, 512, 256, 128):
            if F % cand == 0:
                tf = cand
                break

    lane_bytes_x = _round_up(tf, _LANE) * itemsize
    per_row_bytes = (2 * lane_bytes_x                 # double-buffered x rows
                     + 2 * _LANE * out_itemsize       # double-buffered (TM,1) output
                     + _LANE * 4)                     # f32 accumulator scratch
    tm_budget = max(_SUBLANE, (block_budget // per_row_bytes) // _SUBLANE * _SUBLANE)
    if max_block_m is not None:
        tm_budget = min(tm_budget, max(_SUBLANE, _round_up(max_block_m, _SUBLANE)))
    tm = B if B <= tm_budget else tm_budget
    grid = (pl.cdiv(B, tm), F // tf)

    w_row = jnp.reshape(w_flat, (1, F))
    out = pl.pallas_call(
        _logreg_rowmajor_kernel,
        out_shape=jax.ShapeDtypeStruct((B, 1), out_dtype),
        grid=grid,
        in_specs=[
            pl.BlockSpec((tm, tf), lambda i, k: (i, k)),           # x tile, pipelined
            pl.BlockSpec((1, tf), lambda i, k: (0, k)),            # weight slice
            pl.BlockSpec(memory_space=pltpu.MemorySpace.SMEM),     # bias scalar
        ],
        out_specs=pl.BlockSpec((tm, 1), lambda i, k: (i, 0)),
        scratch_shapes=[pltpu.VMEM((tm, 1), jnp.float32)],
        compiler_params=pltpu.CompilerParams(
            dimension_semantics=("parallel", "arbitrary"),
            vmem_limit_bytes=vmem_limit,
        ),
        cost_estimate=cost,
    )(x, w_row, b1)
    return out


if __name__ == "__main__":
    # Module semantics: num_features inputs, 1 output, weight & bias zero-init.
    num_features = 2   # matches the iris slice (usecols=range(2)) in the script
    batch = 8

    key = jax.random.PRNGKey(0)
    kx, kw, kb, kx2, kw3, kx3 = jax.random.split(key, 6)
    x = jax.random.normal(kx, (batch, num_features), dtype=jnp.float32)
    w = jnp.zeros((1, num_features), dtype=jnp.float32)   # explicit zero init
    b = jnp.zeros((1,), dtype=jnp.float32)

    probas = jax.block_until_ready(logistic_regression3_forward(x, w, b))
    ref = jax.nn.sigmoid(x @ w.T + b)
    assert probas.shape == (batch, 1)
    assert jnp.allclose(probas, ref, atol=1e-5), (probas, ref)

    # Non-zero params + non-multiple-of-128 batch + forced multi-tile grid:
    # exercises the masked boundary tile without any wrapper-side padding.
    w2 = jax.random.normal(kw, (1, num_features), dtype=jnp.float32)
    b2 = jax.random.normal(kb, (1,), dtype=jnp.float32)
    x2 = jax.random.normal(kx2, (300, num_features), dtype=jnp.float32)
    p2 = jax.block_until_ready(
        logistic_regression3_forward(x2, w2, b2, max_block_b=128))
    r2 = jax.nn.sigmoid(x2 @ w2.T + b2)
    assert p2.shape == (300, 1)
    assert jnp.allclose(p2, r2, atol=1e-5, rtol=1e-5), (p2, r2)

    # Transpose-free small-F path: caller supplies x feature-major (F, B).
    p2b = jax.block_until_ready(
        logistic_regression3_forward(jnp.transpose(x2), w2, b2, x_feature_major=True))
    assert jnp.allclose(p2b, r2, atol=1e-5, rtol=1e-5), (p2b, r2)

    # Wide-feature path: row-major blocking with an F-reduction grid axis
    # and a VMEM accumulator (F=384 -> tf=128, 3 reduction steps).
    F3, B3 = 384, 100
    x3 = jax.random.normal(kx3, (B3, F3), dtype=jnp.float32) / jnp.sqrt(F3)
    w3 = jax.random.normal(kw3, (1, F3), dtype=jnp.float32)
    b3 = 0.25 * jnp.ones((1,), jnp.float32)
    p3 = jax.block_until_ready(logistic_regression3_forward(x3, w3, b3))
    r3 = jax.nn.sigmoid(x3 @ w3.T + b3)
    assert p3.shape == (B3, 1)
    assert jnp.allclose(p3, r3, atol=1e-5, rtol=1e-5), (p3, r3)

    print("KERNEL_OK")
</pallas_src>

<mosaic_0001>
module attributes {stable_mosaic.version = 11 : i64} {
  func.func @_logreg_featmajor_kernel(%arg0: i32, %arg1: memref<2x8xf32, #tpu.memory_space<vmem>>, %arg2: memref<2x1xf32, #tpu.memory_space<vmem>>, %arg3: memref<1xf32, #tpu.memory_space<smem>>, %arg4: memref<1x8xf32, #tpu.memory_space<vmem>>) attributes {dimension_semantics = [#tpu.dimension_semantics<parallel>], iteration_bounds = array<i64: 1>, scalar_prefetch = 0 : i64, scratch_operands = 0 : i64, tpu.core_type = #tpu.core_type<tc>, window_params = [{transform_indices = @transform_0, window_bounds = array<i64: 2, 8>}, {pipeline_mode = #tpu.pipeline_mode<synchronous>, transform_indices = @transform_1, window_bounds = array<i64: 2, 1>}, {transform_indices = @transform_2, window_bounds = array<i64: 1>}, {transform_indices = @transform_3, window_bounds = array<i64: 1, 8>}]} {
    %c0 = arith.constant 0 : index
    %c0_0 = arith.constant 0 : index
    %0 = vector.load %arg1[%c0, %c0_0] : memref<2x8xf32, #tpu.memory_space<vmem>>, vector<2x8xf32>
    %c0_1 = arith.constant 0 : index
    %c0_2 = arith.constant 0 : index
    %1 = vector.load %arg2[%c0_1, %c0_2] : memref<2x1xf32, #tpu.memory_space<vmem>>, vector<2x1xf32>
    %2 = vector.broadcast %1 : vector<2x1xf32> to vector<2x8xf32>
    %3 = arith.mulf %0, %2 : vector<2x8xf32>
    %cst = arith.constant dense<0.000000e+00> : vector<8xf32>
    %4 = vector.multi_reduction <add>, %3, %cst [0] : vector<2x8xf32> to vector<8xf32>
    %5 = vector.shape_cast %4 : vector<8xf32> to vector<1x8xf32>
    %c0_3 = arith.constant 0 : index
    %6 = memref.load %arg3[%c0_3] : memref<1xf32, #tpu.memory_space<smem>>
    %7 = vector.broadcast %6 : f32 to vector<1x8xf32>
    %8 = arith.addf %5, %7 : vector<1x8xf32>
    %cst_4 = arith.constant 0.000000e+00 : f32
    %9 = vector.broadcast %cst_4 : f32 to vector<1x8xf32>
    %10 = arith.subf %9, %8 : vector<1x8xf32>
    %11 = math.exp %10 : vector<1x8xf32>
    %cst_5 = arith.constant 1.000000e+00 : f32
    %12 = vector.broadcast %cst_5 : f32 to vector<1x8xf32>
    %13 = arith.addf %12, %11 : vector<1x8xf32>
    %cst_6 = arith.constant 1.000000e+00 : f32
    %14 = vector.broadcast %cst_6 : f32 to vector<1x8xf32>
    %15 = arith.divf %14, %13 : vector<1x8xf32>
    %c0_7 = arith.constant 0 : index
    %c0_8 = arith.constant 0 : index
    %16 = vector.load %arg4[%c0_7, %c0_8] : memref<1x8xf32, #tpu.memory_space<vmem>>, vector<1x8xf32>
    tpu.vector_store %arg4[%c0_7, %c0_8], %15 {strides = array<i32>} : memref<1x8xf32, #tpu.memory_space<vmem>>, vector<1x8xf32>,
    return
  }
  func.func @transform_0(%arg0: i32) -> (i32, i32) {
    %c0_i32 = arith.constant 0 : i32
    %c0_i32_0 = arith.constant 0 : i32
    return %c0_i32, %arg0 : i32, i32
  }
  func.func @transform_1(%arg0: i32) -> (i32, i32) {
    %c0_i32 = arith.constant 0 : i32
    %c0_i32_0 = arith.constant 0 : i32
    %c0_i32_1 = arith.constant 0 : i32
    return %c0_i32, %c0_i32_0 : i32, i32
  }
  func.func @transform_2(%arg0: i32) -> i32 {
    %c0_i32 = arith.constant 0 : i32
    %c0_i32_0 = arith.constant 0 : i32
    return %c0_i32 : i32
  }
  func.func @transform_3(%arg0: i32) -> (i32, i32) {
    %c0_i32 = arith.constant 0 : i32
    %c0_i32_0 = arith.constant 0 : i32
    return %c0_i32, %arg0 : i32, i32
  }
}

</mosaic_0001>

<bundles_post_ra>
// kernel: tpu_custom_call.1
= control target key start
LH: loop header
LB: loop body
LE: loop exit
PB: predicated region body
PF: predicated region fallthrough
CT: control target
= control target key end

     0   :  { %s131_s0 = inlined_call_operand.vmem [shape: f32[2,8], index: 0, kind: input, shape index: {}]   ;;  %s132_s1 = inlined_call_operand.vmem [shape: f32[2,1], index: 1, kind: input, shape index: {}]   ;;  %s133_s2 = inlined_call_operand.<no memory space> [shape: f32[1], index: 2, kind: input, shape index: {}]   ;;  %s134_s3 = inlined_call_operand.hbm [shape: f32[1,8], index: 3, kind: output, shape index: {}]  }
   0x1   :  { %v17_v0 = vld [vmem:[%s132_s1] sm:$0x3] }
   0x2   :  { %9 = vsyncpa [#allocation4], 0  ;;  %v88_v1 = vmov 0   ;;  %v16_v2 = vld [vmem:[%s131_s0] sm:$0x3]  ;;  %vm24_vm0 = vcmask 58368   ;;  %v33_v11 = vstv %s133_s2 }
   0x3   :  { %59 = vset.pattern.permute.xlu0 %v88_v1  ;;  %s89_s0 = smov [#allocation3]   ;;  %vm41_vm1 = vcmask 57344  }
   0x4   :  { %20 = vperm.xlu0 %59, %v17_v0   ;;  %s49_s1 = sshll.u32 %s89_s0, 4  ;;  %s50_s1 = int_to_ptr.vmem [resolvable:$true] %s49_s1 }
   0x5   :  { %s64_s18 = scalar_lea.vmem %s50_s1, 16  ;;  %s68_s19 = scalar_lea.vmem %s50_s1, 32 }
   0x6   :  { %p65_p0 = scmp.ne.s32.totalorder %s50_s1, %s64_s18  ;;  %p69_p1 = scmp.lt.s32.totalorder %s50_s1, %s50_s1 }
   0x7   :  { %p70_p2 = scmp.lt.s32.totalorder %s68_s19, %s64_s18 }
   0x9   :  { %p71_p3 = por %p70_p2, %p69_p1 }
   0xb   :  { %p72_p4 = pnand %p71_p3, %p65_p0 }
  0x83   :  { %v21_v3 = vpop.permute.xlu0 %20 }
  0x84   :  { %v23_v4 = vmul.f32 %v21_v3, %v16_v2 }
  0x86   :  { %v25_v5 = vsel %vm24_vm0, %v23_v4, 0.0 }
  0x87   :  { %v26_v6 = vrot.slane %v25_v5, 4 }
  0x89   :  { %v27_v7 = vadd.f32 %v26_v6, %v25_v5 }
  0x8b   :  { %v28_v8 = vrot.slane %v27_v7, 2 }
  0x8d   :  { %v29_v9 = vadd.f32 %v28_v8, %v27_v7 }
  0x8f   :  { %v30_v10 = vrot.slane %v29_v9, 1 }
  0x91   :  { %v31_v12 = vadd.f32 %v30_v10, %v29_v9 }
  0x93   :  { %v34_v13 = vadd.f32 %v33_v11, %v31_v12 }
  0x95   :  { %v35_v14 = vsub.f32 0.0, %v34_v13 }
  0x97   :  { %v36_v15 = vmul.f32 1.442695, %v35_v14 }
  0x99   :  { %60 = vpow2.f32 %v36_v15 }
  0xa3   :  { %v61_v16 = vpop.eup %60 }
  0xa4   :  { %v38_v17 = vadd.f32 1.0, %v61_v16 }
  0xa6   :  { %62 = vrcp.f32 %v38_v17 }
  0xb0   :  { %v63_v18 = vpop.eup %62 }
  0xb1   :  { %42 = vst.msk [vmem:[#allocation3] sm:$0x1] %vm41_vm1, %v63_v18 }
  0xb2   :  { %75 = shalt.err (!%p72_p4)
}
  0xb3   :  { %s76_s21 = scalar_lea.hbm %s134_s3, 16 }
  0xb4   :  { %p77_p5 = scmp.ne.s32.totalorder %s134_s3, %s76_s21  ;;  %p80_p6 = scmp.lt.u32.totalorder %s76_s21, %s134_s3 }
  0xb6   :  { %p82_p7 = pnand %p80_p6, %p77_p5 }
  0xb8   :  { %85 = shalt.err (!%p82_p7)
}
  0xb9   :  { %52 = dma.vmem_to_hbm [thread:$0]  %s50_s1, 16, %s134_s3, [#allocation4]  }
  0xba   :  { %86 = dma.done.wait [#allocation4], 16  }
  0xbb   :  { %87 = vsyncadd [#allocation4], 4294967280 }
  0xbc   :  { %56 = vsyncpa [#allocation4], 1 }

</bundles_post_ra>
